<compile_context>
chip_gen: v5e
topology: v5e:2x2
jax: 0.10.0
libtpu: 0.0.40
codegen_flags: <defaults>
</compile_context>

<pallas_src>
import functools

import jax
import jax.numpy as jnp
from jax.experimental import pallas as pl
from jax.experimental.pallas import tpu as pltpu

_LANE = 128
_SUBLANE = 8


def _round_up(x, m):
    return ((x + m - 1) // m) * m


@functools.lru_cache(maxsize=1)
def _vmem_capacity_bytes():
    # One-time, setup-path hardware query (not wrapped around the kernel
    # call, so it cannot mask kernel failures).  Conservative v7x-sized
    # fallback if the query is unavailable.
    try:
        return int(pltpu.get_tpu_info().vmem_capacity_bytes)
    except Exception:
        return 64 * 1024 * 1024


# ---------------------------------------------------------------------------
# Kernels (one row tile of x per grid step; weights fully resident)
# ---------------------------------------------------------------------------
def _resblock_kernel_shortcut(x_ref, w0_ref, b0_ref, w1_ref, b1_ref, ws_ref,
                              o_ref):
    """size_in != size_out: learned linear shortcut (no bias)."""
    x = x_ref[...]
    xf = x.astype(jnp.float32)
    a0 = jnp.maximum(xf, 0.0).astype(jnp.bfloat16)            # actvn(x)
    net = jnp.dot(a0, w0_ref[...],
                  preferred_element_type=jnp.float32) + b0_ref[...]
    a1 = jnp.maximum(net, 0.0).astype(jnp.bfloat16)           # actvn(net)
    dx = jnp.dot(a1, w1_ref[...],
                 preferred_element_type=jnp.float32) + b1_ref[...]
    x_s = jnp.dot(x.astype(jnp.bfloat16), ws_ref[...],
                  preferred_element_type=jnp.float32)
    o_ref[...] = (x_s + dx).astype(o_ref.dtype)


def _resblock_kernel_identity(x_ref, w0_ref, b0_ref, w1_ref, b1_ref, o_ref):
    """size_in == size_out: identity shortcut (residual add stays f32)."""
    xf = x_ref[...].astype(jnp.float32)
    a0 = jnp.maximum(xf, 0.0).astype(jnp.bfloat16)
    net = jnp.dot(a0, w0_ref[...],
                  preferred_element_type=jnp.float32) + b0_ref[...]
    a1 = jnp.maximum(net, 0.0).astype(jnp.bfloat16)
    dx = jnp.dot(a1, w1_ref[...],
                 preferred_element_type=jnp.float32) + b1_ref[...]
    o_ref[...] = (xf + dx).astype(o_ref.dtype)


# ---------------------------------------------------------------------------
# One-time parameter preparation (hoisted out of the forward path)
# ---------------------------------------------------------------------------
def _is_prepared(params):
    return params["w0"].dtype == jnp.bfloat16 and params["b0"].ndim == 2


def prepare_params(params):
    """Cast weights to bf16 and reshape biases to (1, n) ONCE.

    Call this once and reuse the result across forward calls so the cast /
    reshaped copies are not re-materialized in HBM every step.  Raw params
    also work (they are prepared lazily inside `resnet_block_fc`).
    """
    if _is_prepared(params):
        return params
    out = {
        "w0": jnp.asarray(params["w0"], jnp.bfloat16),
        "b0": jnp.asarray(params["b0"], jnp.float32).reshape(1, -1),
        "w1": jnp.asarray(params["w1"], jnp.bfloat16),
        "b1": jnp.asarray(params["b1"], jnp.float32).reshape(1, -1),
    }
    if "ws" in params:
        out["ws"] = jnp.asarray(params["ws"], jnp.bfloat16)
    return out


# ---------------------------------------------------------------------------
# Wrapper
# ---------------------------------------------------------------------------
@functools.partial(jax.jit, static_argnames=("tile_m",))
def resnet_block_fc(x, params, *, tile_m=512):
    """ResnetBlockFC forward with a fused Pallas TPU kernel.

    x      : [..., size_in], f32 or bf16 (output keeps x's dtype).
    params : raw or `prepare_params`-ed dict with
             w0 [size_in,size_h], b0 [size_h], w1 [size_h,size_out],
             b1 [size_out], optionally ws [size_in,size_out] (no bias).
    """
    p = params if _is_prepared(params) else prepare_params(params)

    orig_shape = x.shape
    size_in = orig_shape[-1]
    if x.ndim != 2:
        x = x.reshape(-1, size_in)
    M = x.shape[0]

    size_h = p["w0"].shape[1]
    size_out = p["w1"].shape[1]
    has_shortcut = "ws" in p
    assert p["w0"].shape[0] == size_in

    out_dtype = x.dtype
    x_itemsize = jnp.dtype(x.dtype).itemsize
    out_itemsize = jnp.dtype(out_dtype).itemsize
    row_align = max(_SUBLANE, 32 // max(1, x_itemsize))   # 8 for f32, 16 for bf16

    # ---- VMEM accounting (double-buffered operands + kernel temporaries) ----
    in_lane = _round_up(size_in, _LANE)
    h_lane = _round_up(size_h, _LANE)
    out_lane = _round_up(size_out, _LANE)

    def _w_vmem(rows, cols):   # bf16 weight footprint (16-row sublane packing)
        return _round_up(rows, 16) * _round_up(cols, _LANE) * 2

    def _b_vmem(cols):         # f32 (1, cols) bias footprint
        return _SUBLANE * _round_up(cols, _LANE) * 4

    fixed_bytes = 2 * (_w_vmem(size_in, size_h) + _w_vmem(size_h, size_out)
                       + (_w_vmem(size_in, size_out) if has_shortcut else 0)
                       + _b_vmem(size_h) + _b_vmem(size_out))
    per_row = (2 * in_lane * x_itemsize        # double-buffered x tile
               + 2 * out_lane * out_itemsize   # double-buffered out tile
               + 6 * in_lane                   # xf (f32) + a0 (bf16)
               + 6 * h_lane                    # net (f32) + a1 (bf16)
               + 8 * out_lane)                 # dx + x_s (f32)

    capacity = _vmem_capacity_bytes()
    budget = (capacity * 3) // 4               # ~96 MiB v5e/v6e, ~48 MiB v7x

    # ---- Row-tile selection ----
    tm = max(row_align,
             (min(tile_m, _round_up(M, row_align)) // row_align) * row_align)
    if M > row_align:
        # >= 2 grid steps: both v7x TensorCores get work and x/out DMA can
        # overlap compute on every generation.
        tm = min(tm, _round_up(-(-M // 2), row_align))
    while tm > row_align and fixed_bytes + tm * per_row > budget:
        tm = max(row_align, ((tm // 2) // row_align) * row_align)
    if fixed_bytes + tm * per_row > budget:
        # TODO(synk): add hidden-dim (K/N) tiling with an f32 VMEM accumulator
        # for weight sets that do not fit resident (relevant on v7x's 64 MiB).
        raise ValueError(
            f"ResnetBlockFC weights need ~{fixed_bytes} B of VMEM which "
            f"exceeds the budget ({budget} B); hidden-dim tiling is not "
            f"implemented.")

    grid = (pl.cdiv(M, tm),)
    vmem_need = fixed_bytes + tm * per_row
    vmem_limit = min(capacity - 4 * 1024 * 1024,
                     max(32 * 1024 * 1024, vmem_need + vmem_need // 4))
    vmem_limit = max(vmem_limit, vmem_need)

    flops = 2 * M * (size_in * size_h + size_h * size_out
                     + (size_in * size_out if has_shortcut else 0))
    bytes_accessed = (M * size_in * x_itemsize + M * size_out * out_itemsize
                      + 2 * (size_in * size_h + size_h * size_out
                             + (size_in * size_out if has_shortcut else 0))
                      + 4 * (size_h + size_out))

    # ---- Specs: x/out row-tiled; weights/biases resident (constant index) ----
    x_spec = pl.BlockSpec((tm, size_in), lambda i: (i, 0))
    out_spec = pl.BlockSpec((tm, size_out), lambda i: (i, 0))

    def _const(shape):
        return pl.BlockSpec(shape, lambda i: (0, 0))

    in_specs = [x_spec,
                _const((size_in, size_h)), _const((1, size_h)),
                _const((size_h, size_out)), _const((1, size_out))]
    args = [x, p["w0"], p["b0"], p["w1"], p["b1"]]
    kernel = _resblock_kernel_identity
    if has_shortcut:
        in_specs.append(_const((size_in, size_out)))
        args.append(p["ws"])
        kernel = _resblock_kernel_shortcut

    out = pl.pallas_call(
        kernel,
        out_shape=jax.ShapeDtypeStruct((M, size_out), out_dtype),
        grid=grid,
        in_specs=in_specs,
        out_specs=out_spec,
        compiler_params=pltpu.CompilerParams(
            dimension_semantics=("parallel",),
            vmem_limit_bytes=int(vmem_limit)),
        cost_estimate=pl.CostEstimate(
            flops=flops, transcendentals=0, bytes_accessed=bytes_accessed),
    )(*args)

    if len(orig_shape) != 2:
        out = out.reshape(*orig_shape[:-1], size_out)
    return out


# ---------------------------------------------------------------------------
# Parameter init (matches the PyTorch module: fc_1.weight is zero-init) and a
# plain-JAX f32 reference.
# ---------------------------------------------------------------------------
def init_params(key, size_in, size_out=None, size_h=None):
    if size_out is None:
        size_out = size_in
    if size_h is None:
        size_h = min(size_in, size_out)
    k0, k1, k2, k3 = jax.random.split(key, 4)
    params = {
        # stored as [in, out]  (PyTorch Linear.weight is [out, in])
        "w0": 0.1 * jax.random.normal(k0, (size_in, size_h), jnp.float32),
        "b0": 0.1 * jax.random.normal(k1, (size_h,), jnp.float32),
        "w1": jnp.zeros((size_h, size_out), jnp.float32),    # nn.init.zeros_
        "b1": 0.1 * jax.random.normal(k2, (size_out,), jnp.float32),
    }
    if size_in != size_out:
        params["ws"] = 0.1 * jax.random.normal(
            k3, (size_in, size_out), jnp.float32)
    return params


def reference_forward(x, params):
    net = jnp.maximum(x, 0.0) @ params["w0"] + params["b0"]
    dx = jnp.maximum(net, 0.0) @ params["w1"] + params["b1"]
    x_s = x @ params["ws"] if "ws" in params else x
    return x_s + dx


if __name__ == "__main__":
    key = jax.random.PRNGKey(0)
    kx, kp, kw = jax.random.split(key, 3)

    # --- learned-shortcut path (size_in != size_out), PyTorch-style init ----
    M, size_in, size_out = 16, 32, 48
    x = jax.random.normal(kx, (M, size_in), jnp.float32)
    params = init_params(kp, size_in, size_out)        # w1 == 0 (PyTorch init)
    prepared = prepare_params(params)                  # hoisted one-time prep
    out = jax.block_until_ready(resnet_block_fc(x, prepared))
    ref = reference_forward(x, params)
    assert out.shape == (M, size_out) and out.dtype == x.dtype
    assert jnp.allclose(out, ref, atol=5e-2, rtol=5e-2), \
        "mismatch vs reference (shortcut path)"

    # --- same path with a non-zero fc_1 weight so the second matmul is
    #     numerically exercised (zero init would hide fc_1 bugs) -------------
    params_nz = dict(params)
    params_nz["w1"] = 0.1 * jax.random.normal(kw, params["w1"].shape,
                                              jnp.float32)
    prepared_nz = prepare_params(params_nz)
    out_nz = jax.block_until_ready(resnet_block_fc(x, prepared_nz))
    ref_nz = reference_forward(x, params_nz)
    assert jnp.allclose(out_nz, ref_nz, atol=5e-2, rtol=5e-2), \
        "mismatch vs reference (non-zero fc_1)"

    # --- identity-shortcut path, M not a multiple of 8 (partial last block),
    #     raw (unprepared) params also accepted ------------------------------
    M2 = 19
    x2 = jax.random.normal(kx, (M2, size_in), jnp.float32)
    params_id = init_params(kp, size_in)               # size_out == size_in
    out_id = jax.block_until_ready(resnet_block_fc(x2, params_id))
    ref_id = reference_forward(x2, params_id)
    assert out_id.shape == (M2, size_in)
    assert jnp.allclose(out_id, ref_id, atol=5e-2, rtol=5e-2), \
        "mismatch vs reference (identity path, partial block)"

    # --- bf16 I/O path (input dtype preserved; residual still f32 inside) ---
    xb = x.astype(jnp.bfloat16)
    out_b = jax.block_until_ready(resnet_block_fc(xb, prepared_nz))
    ref_b = reference_forward(xb.astype(jnp.float32), params_nz)
    assert out_b.dtype == jnp.bfloat16 and out_b.shape == (M, size_out)
    assert jnp.allclose(out_b.astype(jnp.float32), ref_b,
                        atol=1e-1, rtol=1e-1), \
        "mismatch vs reference (bf16 I/O path)"

    print("KERNEL_OK")
</pallas_src>

<mosaic_0001>
module attributes {stable_mosaic.version = 11 : i64} {
  func.func @_resblock_kernel_shortcut(%arg0: i32, %arg1: memref<8x32xf32, #tpu.memory_space<vmem>>, %arg2: memref<32x32xbf16, #tpu.memory_space<vmem>>, %arg3: memref<1x32xf32, #tpu.memory_space<vmem>>, %arg4: memref<32x48xbf16, #tpu.memory_space<vmem>>, %arg5: memref<1x48xf32, #tpu.memory_space<vmem>>, %arg6: memref<32x48xbf16, #tpu.memory_space<vmem>>, %arg7: memref<8x48xf32, #tpu.memory_space<vmem>>) attributes {dimension_semantics = [#tpu.dimension_semantics<parallel>], iteration_bounds = array<i64: 2>, scalar_prefetch = 0 : i64, scratch_operands = 0 : i64, tpu.core_type = #tpu.core_type<tc>, window_params = [{transform_indices = @transform_0, window_bounds = array<i64: 8, 32>}, {pipeline_mode = #tpu.pipeline_mode<synchronous>, transform_indices = @transform_1, window_bounds = array<i64: 32, 32>}, {pipeline_mode = #tpu.pipeline_mode<synchronous>, transform_indices = @transform_2, window_bounds = array<i64: 1, 32>}, {pipeline_mode = #tpu.pipeline_mode<synchronous>, transform_indices = @transform_3, window_bounds = array<i64: 32, 48>}, {pipeline_mode = #tpu.pipeline_mode<synchronous>, transform_indices = @transform_4, window_bounds = array<i64: 1, 48>}, {pipeline_mode = #tpu.pipeline_mode<synchronous>, transform_indices = @transform_5, window_bounds = array<i64: 32, 48>}, {transform_indices = @transform_6, window_bounds = array<i64: 8, 48>}]} {
    %c0 = arith.constant 0 : index
    %c0_0 = arith.constant 0 : index
    %0 = vector.load %arg1[%c0, %c0_0] : memref<8x32xf32, #tpu.memory_space<vmem>>, vector<8x32xf32>
    %cst = arith.constant 0.000000e+00 : f32
    %1 = vector.broadcast %cst : f32 to vector<8x32xf32>
    %2 = arith.maximumf %0, %1 : vector<8x32xf32>
    %3 = arith.truncf %2 : vector<8x32xf32> to vector<8x32xbf16>
    %c0_1 = arith.constant 0 : index
    %c0_2 = arith.constant 0 : index
    %4 = vector.load %arg2[%c0_1, %c0_2] : memref<32x32xbf16, #tpu.memory_space<vmem>>, vector<32x32xbf16>
    %cst_3 = arith.constant dense<0.000000e+00> : vector<8x32xf32>
    %5 = tpu.matmul %3, %4, %cst_3 {dimension_numbers = #tpu.dot_dimension_numbers<[1], [0], [0], [1], [0, 0, 1, 1], [], []>} : vector<8x32xbf16>, vector<32x32xbf16>, vector<8x32xf32> -> vector<8x32xf32>
    %c0_4 = arith.constant 0 : index
    %c0_5 = arith.constant 0 : index
    %6 = vector.load %arg3[%c0_4, %c0_5] : memref<1x32xf32, #tpu.memory_space<vmem>>, vector<1x32xf32>
    %7 = vector.broadcast %6 : vector<1x32xf32> to vector<8x32xf32>
    %8 = arith.addf %5, %7 : vector<8x32xf32>
    %cst_6 = arith.constant 0.000000e+00 : f32
    %9 = vector.broadcast %cst_6 : f32 to vector<8x32xf32>
    %10 = arith.maximumf %8, %9 : vector<8x32xf32>
    %11 = arith.truncf %10 : vector<8x32xf32> to vector<8x32xbf16>
    %c0_7 = arith.constant 0 : index
    %c0_8 = arith.constant 0 : index
    %12 = vector.load %arg4[%c0_7, %c0_8] : memref<32x48xbf16, #tpu.memory_space<vmem>>, vector<32x48xbf16>
    %cst_9 = arith.constant dense<0.000000e+00> : vector<8x48xf32>
    %13 = tpu.matmul %11, %12, %cst_9 {dimension_numbers = #tpu.dot_dimension_numbers<[1], [0], [0], [1], [0, 0, 1, 1], [], []>} : vector<8x32xbf16>, vector<32x48xbf16>, vector<8x48xf32> -> vector<8x48xf32>
    %c0_10 = arith.constant 0 : index
    %c0_11 = arith.constant 0 : index
    %14 = vector.load %arg5[%c0_10, %c0_11] : memref<1x48xf32, #tpu.memory_space<vmem>>, vector<1x48xf32>
    %15 = vector.broadcast %14 : vector<1x48xf32> to vector<8x48xf32>
    %16 = arith.addf %13, %15 : vector<8x48xf32>
    %17 = arith.truncf %0 : vector<8x32xf32> to vector<8x32xbf16>
    %c0_12 = arith.constant 0 : index
    %c0_13 = arith.constant 0 : index
    %18 = vector.load %arg6[%c0_12, %c0_13] : memref<32x48xbf16, #tpu.memory_space<vmem>>, vector<32x48xbf16>
    %cst_14 = arith.constant dense<0.000000e+00> : vector<8x48xf32>
    %19 = tpu.matmul %17, %18, %cst_14 {dimension_numbers = #tpu.dot_dimension_numbers<[1], [0], [0], [1], [0, 0, 1, 1], [], []>} : vector<8x32xbf16>, vector<32x48xbf16>, vector<8x48xf32> -> vector<8x48xf32>
    %20 = arith.addf %19, %16 : vector<8x48xf32>
    %c0_15 = arith.constant 0 : index
    %c0_16 = arith.constant 0 : index
    %21 = vector.load %arg7[%c0_15, %c0_16] : memref<8x48xf32, #tpu.memory_space<vmem>>, vector<8x48xf32>
    tpu.vector_store %arg7[%c0_15, %c0_16], %20 {strides = array<i32>} : memref<8x48xf32, #tpu.memory_space<vmem>>, vector<8x48xf32>,
    return
  }
  func.func @transform_0(%arg0: i32) -> (i32, i32) {
    %c0_i32 = arith.constant 0 : i32
    %c0_i32_0 = arith.constant 0 : i32
    return %arg0, %c0_i32 : i32, i32
  }
  func.func @transform_1(%arg0: i32) -> (i32, i32) {
    %c0_i32 = arith.constant 0 : i32
    %c0_i32_0 = arith.constant 0 : i32
    %c0_i32_1 = arith.constant 0 : i32
    return %c0_i32, %c0_i32_0 : i32, i32
  }
  func.func @transform_2(%arg0: i32) -> (i32, i32) {
    %c0_i32 = arith.constant 0 : i32
    %c0_i32_0 = arith.constant 0 : i32
    %c0_i32_1 = arith.constant 0 : i32
    return %c0_i32, %c0_i32_0 : i32, i32
  }
  func.func @transform_3(%arg0: i32) -> (i32, i32) {
    %c0_i32 = arith.constant 0 : i32
    %c0_i32_0 = arith.constant 0 : i32
    %c0_i32_1 = arith.constant 0 : i32
    return %c0_i32, %c0_i32_0 : i32, i32
  }
  func.func @transform_4(%arg0: i32) -> (i32, i32) {
    %c0_i32 = arith.constant 0 : i32
    %c0_i32_0 = arith.constant 0 : i32
    %c0_i32_1 = arith.constant 0 : i32
    return %c0_i32, %c0_i32_0 : i32, i32
  }
  func.func @transform_5(%arg0: i32) -> (i32, i32) {
    %c0_i32 = arith.constant 0 : i32
    %c0_i32_0 = arith.constant 0 : i32
    %c0_i32_1 = arith.constant 0 : i32
    return %c0_i32, %c0_i32_0 : i32, i32
  }
  func.func @transform_6(%arg0: i32) -> (i32, i32) {
    %c0_i32 = arith.constant 0 : i32
    %c0_i32_0 = arith.constant 0 : i32
    return %arg0, %c0_i32 : i32, i32
  }
}

</mosaic_0001>

<bundles_post_ra>
// kernel: resnet_block_fc.1
= control target key start
LH: loop header
LB: loop body
LE: loop exit
PB: predicated region body
PF: predicated region fallthrough
CT: control target
= control target key end

     0   :  { %s1156_s0 = inlined_call_operand.hbm [shape: f32[16,32], index: 0, kind: input, shape index: {}]   ;;  %s1157_s1 = inlined_call_operand.hbm [shape: bf16[32,32], index: 1, kind: input, shape index: {}]   ;;  %s1158_s2 = inlined_call_operand.hbm [shape: f32[1,32], index: 2, kind: input, shape index: {}]   ;;  %s1159_s3 = inlined_call_operand.hbm [shape: bf16[32,48], index: 3, kind: input, shape index: {}]   ;;  %s1160_s4 = inlined_call_operand.vmem [shape: f32[1,48], index: 4, kind: input, shape index: {}]   ;;  %s1161_s5 = inlined_call_operand.hbm [shape: bf16[32,48], index: 5, kind: input, shape index: {}]   ;;  %s1162_s6 = inlined_call_operand.hbm [shape: f32[16,48], index: 6, kind: output, shape index: {}]  }
   0x1   :  { %1163 = sst [smem:[#allocation16_spill]] %s1157_s1 }
   0x2   :  { %11 = vsyncpa [#allocation3], 0 }
   0x3   :  { %13 = vsyncpa [#allocation3 + $0x1], 0 }
   0x4   :  { %14 = vsyncpa [#allocation6], 0 }
   0x5   :  { %15 = vsyncpa [#allocation9], 0 }
   0x6   :  { %16 = vsyncpa [#allocation4], 0 }
   0x7   :  { %18 = vsyncpa [#allocation4 + $0x1], 0  ;;  %s982_s21 = smov 0   ;;  %s984_s22 = smov 0  }
   0x8   :  { %s986_s23 = smov 0   ;;  %s988_s24 = smov 0  }
   0x9 LB: > { %s1164_s1 = sld [smem:[#allocation16_spill]]  ;;  %s1006_s28 = sadd.s32 4294967295, %s939_s24   ;;  %s939_s24 = sphi %s988_s24, %s1176_s24   ;;  %s935_s23 = sphi %s986_s23, %s1175_s23   ;;  %s931_s22 = sphi %s984_s22, %s1174_s22   ;;  %s927_s21 = sphi %s982_s21, %s1173_s21  }
   0xa   : > { %p572_p0 = scmp.ge.s32.totalorder %s939_s24, 1  ;;  %p45_p1 = scmp.eq.s32.totalorder %s1006_s28, 0 }
   0xb   : > { %p186_p2 = scmp.lt.s32.totalorder %s939_s24, 3  ;;  %s941_s30 = smov [#allocation5]  }
   0xc   : > { %s199_s7 = sshll.u32 %s941_s30, 4  ;;  %s223_s10 = sshll.u32 %s1159_s3, 4  ;;  %s200_s7 = int_to_ptr.vmem [resolvable:$true] %s199_s7  ;;  %s224_s10 = int_to_ptr.hbm [resolvable:$true] %s223_s10 }
   0xd   : > { %p1011_p3 = pnand %p572_p0, %p186_p2  ;;  %s212_s14 = sshll.u32 %s1158_s2, 4  ;;  %s213_s14 = int_to_ptr.hbm [resolvable:$true] %s212_s14 }
   0xe   : > { %s942_s15 = smov [#allocation8]   ;;  %s943_s17 = smov 64  }
   0xf   : > { %s197_s27 = sshll.u32 %s1164_s1, 4  ;;  %p644_p4 = pneg %p1011_p3  ;;  %s198_s27 = int_to_ptr.hbm [resolvable:$true] %s197_s27 }
  0x10   : > { %s225_s16 = sshll.u32 %s942_s15, 4  ;;  %s944_s18 = smov 4   ;;  %s226_s16 = int_to_ptr.vmem [resolvable:$true] %s225_s16 }
  0x11   : > { %p1023_p6 = pnand %p644_p4, %p45_p1  ;;  %s240_s25 = sshll.u32 %s1161_s5, 4  ;;  %s241_s25 = int_to_ptr.hbm [resolvable:$true] %s240_s25 }
  0x12   : > { %s945_s26 = smov [#allocation7]   ;;  %s571_s8 = sadd.s32 4294967294, %s939_s24  }
  0x13   : > { %647 = dma.hbm_to_vmem [thread:$0]  (!%p1023_p6), %s198_s27, 256, %s200_s7, [#allocation6], %s943_s17, %s943_s17, %s944_s18  }
  0x14   : > { %653 = dma.hbm_to_vmem [thread:$0]  (!%p1023_p6), %s224_s10, 256, %s226_s16, [#allocation9], %s943_s17, %s943_s17, %s944_s18  }
  0x15   : > { %s214_s30 = sshll.u32 %s945_s26, 4  ;;  %s946_s27 = smov [#allocation10]   ;;  %s215_s30 = int_to_ptr.vmem [resolvable:$true] %s214_s30 }
  0x16   : > { %650 = dma.hbm_to_vmem [thread:$0]  (!%p1023_p6), %s213_s14, 16, %s215_s30, [#allocation6]  }
  0x17   : > { %s242_s7 = sshll.u32 %s946_s27, 4  ;;  %s1043_s9 = sadd.s32 1, %s939_s24   ;;  %s243_s7 = int_to_ptr.vmem [resolvable:$true] %s242_s7 }
  0x18   : > { %656 = dma.hbm_to_vmem [thread:$0]  (!%p1023_p6), %s241_s25, 256, %s243_s7, [#allocation9], %s943_s17, %s943_s17, %s944_s18  }
  0x19   : > { %s28_s10 = ssub.s32 %s939_s24, %s1043_s9  ;;  %s31_s12 = sadd.s32 1, %s935_s23 }
  0x1a   : > { %p29_p7 = scmp.eq.s32.totalorder %s28_s10, 0  ;;  %p38_p8 = scmp.ne.s32.totalorder %s935_s23, %s931_s22 }
  0x1b   : > { %p39_p9 = scmp.eq.s32.totalorder %s939_s24, 0  ;;  %p44_p10 = scmp.ne.s32.totalorder %s931_s22, %s927_s21 }
  0x1c   : > { %s1054_s13 = scalar_select %p29_p7, %s935_s23, %s31_s12  }
  0x1d   : > { %p1056_p11 = por %p39_p9, %p38_p8  ;;  %p1062_p12 = por %p45_p1, %p44_p10 }
  0x1e   : > { %p173_p13 = scmp.eq.s32.totalorder %s1006_s28, 1  ;;  %p179_p0 = scmp.eq.s32.totalorder %s571_s8, 1 }
  0x1f   : > { %p669_p2 = scmp.lt.s32.totalorder %s939_s24, 2  ;;  %s256_s15 = sand.u32 1, %s935_s23  }
  0x20   : > { %p1069_p4 = por %p173_p13, %p38_p8  ;;  %p1073_p6 = por %p179_p0, %p44_p10 }
  0x21   : > { %s578_s18 = sshll.u32 %s256_s15, 3  ;;  %s579_s19 = sshll.u32 %s939_s24, 3 }
  0x22   : > { %s264_s26 = scalar_lea.hbm %s1156_s0, %s579_s19  ;;  %s260_s30 = scalar_lea.vmem [#allocation2], %s578_s18 }
  0x23   : > { %s268_s27 = sshll.u32 %s260_s30, 4  ;;  %s266_s7 = sshll.u32 %s264_s26, 4  ;;  %s269_s27 = int_to_ptr.vmem [resolvable:$true] %s268_s27  ;;  %s267_s7 = int_to_ptr.hbm [resolvable:$true] %s266_s7 }
  0x24   : > { %p1083_p7 = pnand %p669_p2, %p1056_p11  ;;  %s257_s10 = scalar_lea.sflag [#allocation3], %s256_s15 }
  0x25   : > { %s835_s12 = sshra.s32 %s267_s7, 4  ;;  %s842_s20 = scalar_lea.hbm %s1156_s0, 16  ;;  %s836_s12 = int_to_ptr.hbm [resolvable:$true] %s835_s12 }
  0x26   : > { %s837_s1 = scalar_lea.hbm %s836_s12, 8  ;;  %p839_p9 = pneg %p1083_p7 }
  0x27   : > { %p838_p8 = scmp.ne.s32.totalorder %s836_s12, %s837_s1  ;;  %p843_p11 = scmp.lt.s32.totalorder %s836_s12, %s1156_s0 }
  0x28   : > { %p844_p0 = scmp.lt.s32.totalorder %s842_s20, %s837_s1 }
  0x29   : > { %p840_p10 = pnand %p839_p9, %p838_p8 }
  0x2a   : > { %p845_p2 = por %p844_p0, %p843_p11 }
  0x2b   : > { %p841_p13 = pneg %p840_p10 }
  0x2d   : > { %p846_p5 = pnand %p845_p2, %p841_p13 }
  0x2f   : > { %849 = shalt.err (!%p846_p5)
}
  0x30   : > { %660 = dma.hbm_to_vmem [thread:$0]  (!%p1083_p7), %s267_s7, 128, %s269_s27, %s257_s10  }
  0x31   : > { %277 = sbr.rel (%p1011_p3) target bundleno = 333 (0x14d), region = 44  ;;  %s1100_s15 = sand.u32 (!%p1011_p3), 1, %s931_s22  }
  0x32   : > { %s581_s26 = sshll.u32 (!%p1011_p3), %s1100_s15, 3  ;;  %s280_s30 = scalar_lea.sflag (!%p1011_p3), [#allocation3], %s1100_s15 }
  0x33   : > { %s283_s1 = scalar_lea.vmem (!%p1011_p3), [#allocation2], %s581_s26 }
  0x36   : > { %910 = dma.done.wait (%p1062_p12), %s280_s30, 128  }
  0x37   : > { %912 = vsyncadd (%p1062_p12), %s280_s30, 4294967168 }
  0x38   : > { %914 = dma.done.wait (%p45_p1), [#allocation6], 272  }
  0x39   : > { %916 = vsyncadd (%p45_p1), [#allocation6], 4294967024 }
  0x3a   : > { %918 = dma.done.wait (%p45_p1), [#allocation9], 512  }
  0x3b   : > { %920 = vsyncadd (%p45_p1), [#allocation9], 4294966784  ;;  %v619_v0 = vld [vmem:[#allocation5 + $0x8] sm:$0xff]  ;;  %v334_v1 = vld [vmem:[%s283_s1] sm:$0xff]  ;;  %vm357_vm0 = vcmask 261120   ;;  %s615_s29 = sshll.u32 %s1006_s28, 3 }
  0x3c   : > { %v335_v2 = vmax.f32 %v334_v1, 0.0  ;;  %v623_v3 = vld [vmem:[#allocation10 + $0x8] sm:$0xff]  ;;  %367 = vmatpush.bf16.msra.mxu0 %v619_v0  ;;  %v618_v4 = vld [vmem:[#allocation5] sm:$0xff]  ;;  %v412_v7 = vpack.c.bf16 %v334_v1, %v334_v1  ;;  %v620_v9 = vld [vmem:[#allocation8] sm:$0xff]  ;;  %s458_s10 = scalar_lea.hbm %s1162_s6, %s615_s29  ;;  %s332_s12 = scalar_lea.vmem [#allocation11], %s581_s26  ;;  %vm445_vm1 = vcmask 392192  }
  0x3d   : > { %438 = vmatpush.bf16.msra.mxu2 %v623_v3  ;;  %v622_v5 = vld [vmem:[#allocation10] sm:$0xff]  ;;  %v621_v8 = vld [vmem:[#allocation8 + $0x8] sm:$0xff]  ;;  %v713_v10 = vld [vmem:[#allocation7] ss:$0 sm:$0xff]  ;;  %s460_s18 = sshll.u32 %s332_s12, 4  ;;  %s462_s19 = sshll.u32 %s458_s10, 4  ;;  %s461_s18 = int_to_ptr.vmem [resolvable:$true] %s460_s18  ;;  %s463_s19 = int_to_ptr.hbm [resolvable:$true] %s462_s19 }
  0x3e   : > { %v336_v6 = vpack.c.bf16 %v335_v2, %v335_v2  ;;  %405 = vmatpush.bf16.msra.mxu1 %v621_v8  ;;  %v714_v18 = vld [vmem:[%s1160_s4] ss:$0 sm:$0xff]  ;;  %s448_s28 = scalar_lea.sflag [#allocation4], %s1100_s15  ;;  %s879_s20 = sshra.s32 %s463_s19, 4  ;;  %s880_s20 = int_to_ptr.hbm [resolvable:$true] %s879_s20 }
  0x3f   : > { %s881_s25 = scalar_lea.hbm %s880_s20, 8  ;;  %s885_s26 = scalar_lea.hbm %s1162_s6, 16 }
  0x40   : > { %368 = vmatpush.bf16.msra.mxu0 %v618_v4  ;;  %p882_p1 = scmp.ne.s32.totalorder %s880_s20, %s881_s25  ;;  %p886_p12 = scmp.lt.s32.totalorder %s880_s20, %s1162_s6 }
  0x41   : > { %439 = vmatpush.bf16.msra.mxu2 %v622_v5  ;;  %p887_p7 = scmp.lt.s32.totalorder %s885_s26, %s881_s25 }
  0x42   : > { %406 = vmatpush.bf16.msra.mxu1 %v620_v9  ;;  %p883_p3 = pnand %p882_p1, %p1069_p4 }
  0x43   : > { %595 = vmatmul.msk.bf16.vlgmr.msra.gmra.mxu0 %vm357_vm0, %v336_v6  ;;  %p888_p8 = por %p887_p7, %p886_p12 }
  0x44   : > { %613 = vmatmul.msk.bf16.vlgmr.msra.gmra.mxu2 %vm357_vm0, %v412_v7  ;;  %p884_p5 = pneg %p883_p3 }
  0x46   : > { %p889_p9 = pnand %p888_p8, %p884_p5 }
  0xc0   : > { %v370_v11 = vpop.f32.mrf.mxu0 }
  0xc1   : > { %v371_v12 = vadd.f32 %v713_v10, %v370_v11 }
  0xc3   : > { %v374_v13 = vmax.f32 %v371_v12, 0.0 }
  0xc5   : > { %v375_v14 = vpack.c.bf16 %v374_v13, %v374_v13 }
  0xc7   : > { %604 = vmatmul.msk.bf16.vlgmr.msra.gmra.mxu1 %vm357_vm0, %v375_v14  ;;  %v441_v15 = vpop.f32.mrf.mxu2 }
  0xc8   : > { %v372_v16 = vpop.f32.mrf.mxu0 }
  0xcf   : > { %v443_v17 = vpop.f32.mrf.mxu2 }
 0x144   : > { %v408_v19 = vpop.f32.mrf.mxu1 }
 0x145   : > { %v409_v20 = vadd.f32 %v714_v18, %v408_v19 }
 0x147   : > { %v442_v21 = vadd.f32 %v441_v15, %v409_v20 }
 0x149   : > { %446 = vst.msk [vmem:[%s332_s12] sm:$0xff] %vm445_vm1, %v442_v21 }
 0x14a   : > { %892 = shalt.err (!%p889_p9)
}
 0x14b   : > { %642 = dma.vmem_to_hbm [thread:$0]  (%p1069_p4), %s461_s18, 128, %s463_s19, %s448_s28  }
 0x14c   : > { %v410_v22 = vpop.f32.mrf.mxu1 }
 0x14d PF: > { %s474_s15 = sand.u32 1, %s927_s21   ;;  %p1172_p10 = scmp.ge.s32.totalorder %s939_s24, 2 }
 0x14e   : > { %s475_s11 = scalar_lea.sflag [#allocation4], %s474_s15 }
 0x14f   : > { %p662_p13 = pnand %p1172_p10, %p1073_p6 }
 0x151   : > { %p663_p11 = pneg %p662_p13 }
 0x153   : > { %922 = dma.done.wait (%p663_p11), %s475_s11, 128  }
 0x154   : > { %924 = vsyncadd (%p663_p11), %s475_s11, 4294967168  ;;  %p21_p0 = scmp.ge.s32.totalorder %s1043_s9, 4   ;;  %s1173_s21 = smov %s931_s22 }
 0x155   : > { %s1174_s22 = smov %s935_s23  ;;  %s1175_s23 = smov %s1054_s13 }
 0x156   : > { %s1176_s24 = smov %s1043_s9  ;;  %23 = sbr.rel (!%p21_p0) target bundleno = 9 (0x9), region = 105 }
 0x15b   :  { %481 = vsyncpa [#allocation3], 1 }
 0x15c   :  { %483 = vsyncpa [#allocation3 + $0x1], 1 }
 0x15d   :  { %484 = vsyncpa [#allocation6], 1 }
 0x15e   :  { %485 = vsyncpa [#allocation9], 1 }
 0x15f   :  { %486 = vsyncpa [#allocation4], 1 }
 0x160   :  { %488 = vsyncpa [#allocation4 + $0x1], 1 }

</bundles_post_ra>
